<compile_context>
chip_gen: v7x
topology: tpu7x:2x2x1
jax: 0.10.0
libtpu: 0.0.40
codegen_flags: <defaults>
</compile_context>

<pallas_src>
import jax
import jax.numpy as jnp
from jax.experimental import pallas as pl
from jax.experimental.pallas import tpu as pltpu


def _round_up(v, m):
    return ((v + m - 1) // m) * m


def _linear_kernel(x_ref, w_ref, b_ref, o_ref):
    # x: (TB, D_in)   w: (D_in, D_out)   b: (1, D_out) f32   o: (TB, D_out)
    # Canonical (M,K)x(K,N) matmul -> MXU, f32 accumulation.
    acc = jnp.dot(x_ref[...], w_ref[...], preferred_element_type=jnp.float32)
    # Bias add in f32 on the VPU, single cast + store of the unpadded tile.
    o_ref[...] = (acc + b_ref[...]).astype(o_ref.dtype)


def prepare_params(weight, bias, *, compute_dtype=None):
    """One-time parameter prep. Call at init, NOT per forward.

    weight: (D_out, D_in)  -- PyTorch nn.Linear layout.
    bias:   (D_out,)
    Returns (w_t, b2): w_t (D_in, D_out) in compute_dtype (if given),
                       b2  (1, D_out) float32.
    """
    w_t = jnp.asarray(weight).T                       # (D_in, D_out) = (K, N)
    if compute_dtype is not None:
        # bf16 weights pay on all generations (v5e MXU is bf16-native too);
        # accumulation and bias add stay f32 in the kernel.
        w_t = w_t.astype(compute_dtype)
    b2 = jnp.asarray(bias).reshape(1, -1).astype(jnp.float32)
    return w_t, b2


def _tile_vmem_bytes(rows, cols, itemsize):
    # VMEM footprint of one (rows, cols) tile padded to the (8, 128) layout.
    return _round_up(max(rows, 1), 8) * _round_up(max(cols, 1), 128) * itemsize


def linear_forward(x, w_t, b2, *, block_b=512, out_dtype=None):
    """y = x @ w_t + b2   with w_t: (D_in, D_out), b2: (1, D_out)."""
    B, D_in = x.shape
    D_out = w_t.shape[1]
    out_dtype = out_dtype or x.dtype

    # Batch tile: aim for >=2 grid steps (v7x megacore sharding) while keeping
    # each tile a multiple of 8 rows and capped at block_b (default 512 fits
    # comfortably within the 32 MiB scoped VMEM on all generations).
    tb = max(8, min(block_b, _round_up(pl.cdiv(B, 2), 8)))
    grid = (pl.cdiv(B, tb),)

    # Explicit VMEM budget: double-buffered x/out tiles + single-buffered w/b.
    vmem_bytes = (2 * _tile_vmem_bytes(tb, D_in, x.dtype.itemsize)
                  + _tile_vmem_bytes(D_in, D_out, w_t.dtype.itemsize)
                  + _tile_vmem_bytes(1, D_out, 4)
                  + 2 * _tile_vmem_bytes(tb, D_out,
                                         jnp.dtype(out_dtype).itemsize))
    vmem_limit = int(min(100 << 20, max(4 << 20, 2 * vmem_bytes)))

    cost = pl.CostEstimate(
        flops=2 * B * D_in * D_out,
        transcendentals=0,
        bytes_accessed=(x.size * x.dtype.itemsize
                        + w_t.size * w_t.dtype.itemsize
                        + b2.size * 4
                        + B * D_out * jnp.dtype(out_dtype).itemsize),
    )

    return pl.pallas_call(
        _linear_kernel,
        out_shape=jax.ShapeDtypeStruct((B, D_out), out_dtype),
        grid_spec=pltpu.PrefetchScalarGridSpec(
            num_scalar_prefetch=0,
            grid=grid,
            in_specs=[
                # x batch tile: double-buffered (default) so DMA overlaps MXU.
                pl.BlockSpec((tb, D_in), lambda i: (i, 0)),
                # Weight: resident (constant index_map), single-buffered.
                pl.BlockSpec((D_in, D_out), lambda i: (0, 0),
                             pipeline_mode=pl.Buffered(1)),
                # Bias: resident, single-buffered.
                pl.BlockSpec((1, D_out), lambda i: (0, 0),
                             pipeline_mode=pl.Buffered(1)),
            ],
            out_specs=pl.BlockSpec((tb, D_out), lambda i: (i, 0)),
        ),
        compiler_params=pltpu.CompilerParams(
            dimension_semantics=("parallel",),
            vmem_limit_bytes=vmem_limit,
        ),
        cost_estimate=cost,
    )(x, w_t, b2)


def simple_text_classifier(x, weight, bias, **kw):
    """Convenience wrapper matching the PyTorch module's forward signature.

    In real use, call prepare_params() once at init and linear_forward() per
    step so the transpose/cast is not re-run every forward.
    """
    w_t, b2 = prepare_params(weight, bias)
    return linear_forward(x, w_t, b2, **kw)


if __name__ == "__main__":
    # Small shapes consistent with the module: batch=8, input_dim=32, output_dim=16.
    B, D_in, D_out = 8, 32, 16

    key = jax.random.PRNGKey(0)
    kx, kw, kb = jax.random.split(key, 3)

    x = jax.random.normal(kx, (B, D_in), dtype=jnp.float32)
    # Deterministic init mimicking nn.Linear's uniform(-1/sqrt(in), 1/sqrt(in)).
    bound = 1.0 / (D_in ** 0.5)
    weight = jax.random.uniform(kw, (D_out, D_in), minval=-bound, maxval=bound,
                                dtype=jnp.float32)
    bias = jax.random.uniform(kb, (D_out,), minval=-bound, maxval=bound,
                              dtype=jnp.float32)

    # One-time parameter prep (init-path), then the per-step forward.
    w_t, b2 = prepare_params(weight, bias)
    y = linear_forward(x, w_t, b2)
    jax.block_until_ready(y)

    # Correctness check vs plain JAX reference of the PyTorch forward.
    y_ref = x @ weight.T + bias
    assert y.shape == (B, D_out)
    assert jnp.allclose(y, y_ref, atol=1e-5, rtol=1e-5)

    print("KERNEL_OK")
</pallas_src>

<mosaic_0001>
module attributes {stable_mosaic.version = 11 : i64} {
  func.func @_linear_kernel(%arg0: i32, %arg1: memref<8x32xf32, #tpu.memory_space<vmem>>, %arg2: memref<32x16xf32, #tpu.memory_space<vmem>>, %arg3: memref<1x16xf32, #tpu.memory_space<vmem>>, %arg4: memref<8x16xf32, #tpu.memory_space<vmem>>) attributes {dimension_semantics = [#tpu.dimension_semantics<parallel>], iteration_bounds = array<i64: 1>, scalar_prefetch = 0 : i64, scratch_operands = 0 : i64, tpu.core_type = #tpu.core_type<tc>, window_params = [{transform_indices = @transform_0, window_bounds = array<i64: 8, 32>}, {pipeline_mode = #tpu.pipeline_mode<synchronous>, transform_indices = @transform_1, window_bounds = array<i64: 32, 16>}, {pipeline_mode = #tpu.pipeline_mode<synchronous>, transform_indices = @transform_2, window_bounds = array<i64: 1, 16>}, {transform_indices = @transform_3, window_bounds = array<i64: 8, 16>}]} {
    %c0 = arith.constant 0 : index
    %c0_0 = arith.constant 0 : index
    %0 = vector.load %arg1[%c0, %c0_0] : memref<8x32xf32, #tpu.memory_space<vmem>>, vector<8x32xf32>
    %c0_1 = arith.constant 0 : index
    %c0_2 = arith.constant 0 : index
    %1 = vector.load %arg2[%c0_1, %c0_2] : memref<32x16xf32, #tpu.memory_space<vmem>>, vector<32x16xf32>
    %cst = arith.constant dense<0.000000e+00> : vector<8x16xf32>
    %2 = tpu.matmul %0, %1, %cst {dimension_numbers = #tpu.dot_dimension_numbers<[1], [0], [0], [1], [0, 0, 1, 1], [], []>} : vector<8x32xf32>, vector<32x16xf32>, vector<8x16xf32> -> vector<8x16xf32>
    %c0_3 = arith.constant 0 : index
    %c0_4 = arith.constant 0 : index
    %3 = vector.load %arg3[%c0_3, %c0_4] : memref<1x16xf32, #tpu.memory_space<vmem>>, vector<1x16xf32>
    %4 = vector.broadcast %3 : vector<1x16xf32> to vector<8x16xf32>
    %5 = arith.addf %2, %4 : vector<8x16xf32>
    %c0_5 = arith.constant 0 : index
    %c0_6 = arith.constant 0 : index
    %6 = vector.load %arg4[%c0_5, %c0_6] : memref<8x16xf32, #tpu.memory_space<vmem>>, vector<8x16xf32>
    tpu.vector_store %arg4[%c0_5, %c0_6], %5 {strides = array<i32>} : memref<8x16xf32, #tpu.memory_space<vmem>>, vector<8x16xf32>,
    return
  }
  func.func @transform_0(%arg0: i32) -> (i32, i32) {
    %c0_i32 = arith.constant 0 : i32
    %c0_i32_0 = arith.constant 0 : i32
    return %arg0, %c0_i32 : i32, i32
  }
  func.func @transform_1(%arg0: i32) -> (i32, i32) {
    %c0_i32 = arith.constant 0 : i32
    %c0_i32_0 = arith.constant 0 : i32
    %c0_i32_1 = arith.constant 0 : i32
    return %c0_i32, %c0_i32_0 : i32, i32
  }
  func.func @transform_2(%arg0: i32) -> (i32, i32) {
    %c0_i32 = arith.constant 0 : i32
    %c0_i32_0 = arith.constant 0 : i32
    %c0_i32_1 = arith.constant 0 : i32
    return %c0_i32, %c0_i32_0 : i32, i32
  }
  func.func @transform_3(%arg0: i32) -> (i32, i32) {
    %c0_i32 = arith.constant 0 : i32
    %c0_i32_0 = arith.constant 0 : i32
    return %arg0, %c0_i32 : i32, i32
  }
}

</mosaic_0001>

<bundles_post_ra>
// kernel: tpu_custom_call.1
= control target key start
LH: loop header
LB: loop body
LE: loop exit
PB: predicated region body
PF: predicated region fallthrough
CT: control target
= control target key end

     0   :  { %v169_v3 = vmov 0.0|0.0   ;;  %vm170_vm0 = vmmov 0   ;;  %v171_v6 = vmov 0.0   ;;  %s223_s0 = inlined_call_operand.vmem [shape: f32[8,32], index: 0, kind: input, shape index: {}]   ;;  %s224_s1 = inlined_call_operand.vmem [shape: f32[32,16], index: 1, kind: input, shape index: {}]   ;;  %s225_s2 = inlined_call_operand.vmem [shape: f32[1,16], index: 2, kind: input, shape index: {}]   ;;  %s226_s3 = inlined_call_operand.hbm [shape: f32[8,16], index: 3, kind: output, shape index: {}]  }
   0x1   :  { %v16_v0 = vld [vmem:[%s224_s1] sm:$0xff]  ;;  %v17_v1 = vld [vmem:[%s224_s1 + $0x8] sm:$0xff]  ;;  %v18_v2 = vld [vmem:[%s224_s1 + $0x10] sm:$0xff]  ;;  %135 = vmatprep.subr.bf16.mxu0 %v169_v3  ;;  %132 = vmatprep.mubr.msk.f32.mxu0 %vm170_vm0, %v171_v6 }
   0x2   :  { %v136_v4 = vpack.c.bf16 %v17_v1, %v16_v0  ;;  %v19_v5 = vld [vmem:[%s224_s1 + $0x18] sm:$0xff] }
   0x3   :  { %8 = vsyncpa [#allocation3], 0  ;;  %v139_v7 = vpack.c.bf16 %v19_v5, %v18_v2  ;;  %v15_v8 = vld [vmem:[%s223_s0] sm:$0xff]  ;;  %vm27_vm1 = vcmask 261120   ;;  %s172_s24 = smov [#allocation2]   ;;  %vm101_vm2 = vcmask 130048  }
   0x4   :  { %137 = vmatpush3.bf16.msra.mxu0 %v136_v4  ;;  %v117_v9 = vld [vmem:[%s225_s2] ss:$0 sm:$0xff]  ;;  %s109_s1 = sshll.u32 %s172_s24, 4  ;;  %s110_s1 = int_to_ptr.vmem [resolvable:$true] %s109_s1 }
   0x5   :  { %138 = vmatprep.subr.bf16.mxu0 %v169_v3  ;;  %s145_s25 = scalar_lea.vmem %s110_s1, 128  ;;  %p150_p1 = scmp.lt.s32.totalorder %s110_s1, %s110_s1 }
   0x6   :  { %p146_p0 = scmp.ne.s32.totalorder %s110_s1, %s145_s25  ;;  %p151_p2 = scmp.lt.s32.totalorder %s145_s25, %s145_s25 }
   0x8   :  { %140 = vmatpush3.bf16.msra.mxu0 %v139_v7  ;;  %p152_p3 = por %p151_p2, %p150_p1 }
   0xa   :  { %p153_p4 = pnand %p152_p3, %p146_p0 }
   0xb   :  { %133 = vmatmul.mubr.msk.f32.vlgmr.msra.gmra.mrb[0].mxu0 %vm27_vm1, %v15_v8 }
  0xde   :  { %v97_v10 = vpop.f32.mrb[0].mxu0 }
  0xdf   :  { %v98_v11 = vadd.f32 %v117_v9, %v97_v10  ;;  %v134_v12 = vpop.f32.mrb[1].mxu0 }
  0xe1   :  { %102 = vst.msk [vmem:[#allocation2] sm:$0xff] %vm101_vm2, %v98_v11 }
  0xe2   :  { %156 = shalt.err (!%p153_p4)
}
  0xe3   :  { %s157_s27 = scalar_lea.hbm %s226_s3, 128 }
  0xe4   :  { %p158_p5 = scmp.ne.s32.totalorder %s226_s3, %s157_s27  ;;  %p161_p6 = scmp.lt.u32.totalorder %s157_s27, %s226_s3 }
  0xe6   :  { %p163_p7 = pnand %p161_p6, %p158_p5 }
  0xe8   :  { %166 = shalt.err (!%p163_p7)
}
  0xe9   :  { %112 = dma.vmem_to_hbm [thread:$0]  %s110_s1, 128, %s226_s3, [#allocation3]  }
  0xea   :  { %167 = dma.done.wait [#allocation3], 128  }
  0xeb   :  { %168 = vsyncadd [#allocation3], 4294967168 }
  0xec   :  { %116 = vsyncpa [#allocation3], 1 }

</bundles_post_ra>
